<compile_context>
chip_gen: v6e
topology: v6e:2x2x1
jax: 0.10.0
libtpu: 0.0.40
codegen_flags: <defaults>
</compile_context>

<pallas_src>
import jax
import jax.numpy as jnp
from jax.experimental import pallas as pl
from jax.experimental.pallas import tpu as pltpu


NEG_SLOPE = 0.3  # LeakyReLU(0.3) from the PyTorch module


def _leaky_relu(x, neg_slope=NEG_SLOPE):
    return jnp.where(x > 0, x, neg_slope * x)


def _round_up(n, m):
    return pl.cdiv(n, m) * m


def coms_mlp_kernel(x_ref, w1_ref, b1_ref, w2_ref, b2_ref, w3_ref, b3_ref, o_ref):
    """One batch tile of the 3-layer MLP.

    x_ref : (TB, D)  f32      w1_ref: (D, H1)  bf16    b1_ref: (1, H1) f32
    w2_ref: (H1, H2) bf16     b2_ref: (1, H2)  f32
    w3_ref: (1, H2)  f32      b3_ref: (1, 1)   f32 (SMEM scalar)
    o_ref : (TB, 1)  f32
    """
    # In-kernel bf16 cast of x (VPU, hidden under the MXU) instead of a
    # separate wrapper-side XLA cast pass over HBM.
    x_b = x_ref[...].astype(jnp.bfloat16)

    # Layer 1: bf16 MXU matmul, f32 accumulation; bias + LeakyReLU in f32.
    h = jnp.dot(x_b, w1_ref[...], preferred_element_type=jnp.float32)
    h = _leaky_relu(h + b1_ref[...])

    # Layer 2.
    h = jnp.dot(h.astype(w2_ref.dtype), w2_ref[...],
                preferred_element_type=jnp.float32)
    h = _leaky_relu(h + b2_ref[...])

    # Output head (H2 -> 1): VPU multiply + lane reduction (keepdims), stored
    # directly to the (TB, 1) output block.  An N=1 MXU matmul would waste
    # all but one output column; the VALU/XLU slots are idle under the MXU.
    out = jnp.sum(h * w3_ref[...], axis=-1, keepdims=True) + b3_ref[0, 0]
    o_ref[...] = out.astype(o_ref.dtype)


def _pick_tile_rows(D, H1, H2, *, tb_cap, vmem_budget):
    """Largest batch-tile row count that fits the per-tile VMEM budget."""
    # Weights single-buffered (pl.Buffered(1)): W1 + W2 in bf16, small f32 rows.
    fixed = D * H1 * 2 + H1 * H2 * 2 + (H1 + 2 * H2) * 4
    # Per batch row: double-buffered f32 x, ~3 f32 (row, H) intermediates,
    # double-buffered f32 output.
    per_row = 2 * D * 4 + 3 * max(H1, H2) * 4 + 2 * 4
    avail = vmem_budget - fixed - (2 << 20)          # 2 MiB compiler-scratch slack
    tb = (max(avail, 0) // per_row) // 8 * 8
    return int(max(8, min(tb_cap, tb)))


def coms_forward(x, params, *, tb_cap=1024, vmem_budget=24 << 20):
    """Pallas implementation of COMs.forward on a flattened [B, D] input."""
    w1, b1, w2, b2, w3, b3 = params
    B, D = x.shape
    H1 = w1.shape[1]
    H2 = w2.shape[1]

    # --- Tile selection: VMEM-budgeted, balanced, >=2 tiles for v7x megacore.
    tb = _pick_tile_rows(D, H1, H2, tb_cap=tb_cap, vmem_budget=vmem_budget)
    num_tiles = pl.cdiv(B, tb)
    if B >= 16:
        # Give v7x's two TensorCores balanced work (no-op cost on v5e/v6e).
        num_tiles = max(num_tiles, 2)
    tb_eff = _round_up(pl.cdiv(B, num_tiles), 8)     # balanced, sublane-aligned
    b_pad = num_tiles * tb_eff
    assert b_pad >= B and tb_eff % 8 == 0

    # x stays f32 into the kernel (cast to bf16 in-kernel); pad only if needed.
    x_f = x.astype(jnp.float32)
    if b_pad != B:
        x_f = jnp.pad(x_f, ((0, b_pad - B), (0, 0)))

    # Weights cast once (small, VMEM-resident); biases / head stay f32.
    w1_b = w1.astype(jnp.bfloat16)
    w2_b = w2.astype(jnp.bfloat16)
    b1_r = b1.astype(jnp.float32).reshape(1, H1)
    b2_r = b2.astype(jnp.float32).reshape(1, H2)
    w3_row = w3.astype(jnp.float32).reshape(1, H2)   # (H2, 1) -> (1, H2)
    b3_s = b3.astype(jnp.float32).reshape(1, 1)

    weight_bytes = (D * H1 + H1 * H2) * 2 + (H1 + 2 * H2 + 1) * 4
    cost = pl.CostEstimate(
        flops=2 * b_pad * (D * H1 + H1 * H2 + H2),
        transcendentals=0,
        bytes_accessed=b_pad * D * 4 + weight_bytes + b_pad * 4,
    )

    # Constant-index blocks: VMEM-resident and single-buffered.
    resident = dict(pipeline_mode=pl.Buffered(1))

    out = pl.pallas_call(
        coms_mlp_kernel,
        out_shape=jax.ShapeDtypeStruct((b_pad, 1), jnp.float32),
        grid=(num_tiles,),
        in_specs=[
            pl.BlockSpec((tb_eff, D), lambda i: (i, 0)),              # x: pipelined
            pl.BlockSpec((D, H1), lambda i: (0, 0), **resident),      # W1
            pl.BlockSpec((1, H1), lambda i: (0, 0), **resident),      # b1
            pl.BlockSpec((H1, H2), lambda i: (0, 0), **resident),     # W2
            pl.BlockSpec((1, H2), lambda i: (0, 0), **resident),      # b2
            pl.BlockSpec((1, H2), lambda i: (0, 0), **resident),      # w3 row
            pl.BlockSpec(memory_space=pltpu.MemorySpace.SMEM),        # b3 scalar
        ],
        out_specs=pl.BlockSpec((tb_eff, 1), lambda i: (i, 0)),
        compiler_params=pltpu.CompilerParams(
            dimension_semantics=("parallel",),
            # Raise v5e's 16 MiB scoped default; safely below v7x's 64 MiB VMEM.
            vmem_limit_bytes=32 << 20,
        ),
        cost_estimate=cost,
    )(x_f, w1_b, b1_r, w2_b, b2_r, w3_row, b3_s)

    # Shape/ordering guard before dropping padded rows (see review note).
    assert out.shape == (b_pad, 1), out.shape
    return out[:B]


def coms_discrete_forward(x, params, **kw):
    """COMsDiscrete.forward: flatten [B, T, D_in] -> [B, T*D_in], run the MLP."""
    B = x.shape[0]
    return coms_forward(x.reshape(B, -1), params, **kw)


def init_params(key, input_dim, hidden_dims=(256, 256), out_dim=1):
    """Deterministic init matching the shapes of MLP(input_dim, 1, (256, 256))."""
    dims = (input_dim,) + tuple(hidden_dims) + (out_dim,)
    params = []
    for i in range(len(dims) - 1):
        key, kw_, kb = jax.random.split(key, 3)
        fan_in, fan_out = dims[i], dims[i + 1]
        bound = 1.0 / jnp.sqrt(fan_in)
        # stored as [in, out] (transposed relative to nn.Linear.weight)
        w = jax.random.uniform(kw_, (fan_in, fan_out), jnp.float32, -bound, bound)
        b = jax.random.uniform(kb, (1, fan_out), jnp.float32, -bound, bound)
        params.extend([w, b])
    return params


def reference_forward(x, params):
    """Pure-JAX f32 reference for correctness check."""
    w1, b1, w2, b2, w3, b3 = params
    h = _leaky_relu(x @ w1 + b1)
    h = _leaky_relu(h @ w2 + b2)
    return h @ w3 + b3


if __name__ == "__main__":
    # COMsDiscrete(n_input=8, input_dim=4): x is [batch, n_input, input_dim].
    batch, n_input, input_dim = 8, 8, 4
    key = jax.random.PRNGKey(0)
    key, kx = jax.random.split(key)
    x = jax.random.normal(kx, (batch, n_input, input_dim), jnp.float32)

    params = init_params(key, n_input * input_dim, hidden_dims=(256, 256), out_dim=1)

    y = coms_discrete_forward(x, params)
    y = jax.block_until_ready(y)

    y_ref = reference_forward(x.reshape(batch, -1), params)
    assert y.shape == (batch, 1), y.shape
    # bf16 MXU matmuls vs f32 reference -> looser tolerance.
    assert jnp.allclose(y, y_ref, atol=5e-2, rtol=5e-2), (y, y_ref)

    # TODO(synk): adversarial_example / training_step / eval_step drive Adam
    # optimizer loops and autograd; they are training utilities, not part of
    # forward(), so they are not implemented as kernels here.

    print("KERNEL_OK")
</pallas_src>

<mosaic_0001>
module attributes {stable_mosaic.version = 11 : i64} {
  func.func @coms_mlp_kernel(%arg0: i32, %arg1: memref<8x32xf32, #tpu.memory_space<vmem>>, %arg2: memref<32x256xbf16, #tpu.memory_space<vmem>>, %arg3: memref<1x256xf32, #tpu.memory_space<vmem>>, %arg4: memref<256x256xbf16, #tpu.memory_space<vmem>>, %arg5: memref<1x256xf32, #tpu.memory_space<vmem>>, %arg6: memref<1x256xf32, #tpu.memory_space<vmem>>, %arg7: memref<1x1xf32, #tpu.memory_space<smem>>, %arg8: memref<8x1xf32, #tpu.memory_space<vmem>>) attributes {dimension_semantics = [#tpu.dimension_semantics<parallel>], iteration_bounds = array<i64: 1>, scalar_prefetch = 0 : i64, scratch_operands = 0 : i64, tpu.core_type = #tpu.core_type<tc>, window_params = [{transform_indices = @transform_0, window_bounds = array<i64: 8, 32>}, {pipeline_mode = #tpu.pipeline_mode<synchronous>, transform_indices = @transform_1, window_bounds = array<i64: 32, 256>}, {pipeline_mode = #tpu.pipeline_mode<synchronous>, transform_indices = @transform_2, window_bounds = array<i64: 1, 256>}, {pipeline_mode = #tpu.pipeline_mode<synchronous>, transform_indices = @transform_3, window_bounds = array<i64: 256, 256>}, {pipeline_mode = #tpu.pipeline_mode<synchronous>, transform_indices = @transform_4, window_bounds = array<i64: 1, 256>}, {pipeline_mode = #tpu.pipeline_mode<synchronous>, transform_indices = @transform_5, window_bounds = array<i64: 1, 256>}, {transform_indices = @transform_6, window_bounds = array<i64: 1, 1>}, {transform_indices = @transform_7, window_bounds = array<i64: 8, 1>}]} {
    %c0 = arith.constant 0 : index
    %c0_0 = arith.constant 0 : index
    %0 = vector.load %arg1[%c0, %c0_0] : memref<8x32xf32, #tpu.memory_space<vmem>>, vector<8x32xf32>
    %1 = arith.truncf %0 : vector<8x32xf32> to vector<8x32xbf16>
    %c0_1 = arith.constant 0 : index
    %c0_2 = arith.constant 0 : index
    %2 = vector.load %arg2[%c0_1, %c0_2] : memref<32x256xbf16, #tpu.memory_space<vmem>>, vector<32x256xbf16>
    %cst = arith.constant dense<0.000000e+00> : vector<8x256xf32>
    %3 = tpu.matmul %1, %2, %cst {dimension_numbers = #tpu.dot_dimension_numbers<[1], [0], [0], [1], [0, 0, 1, 1], [], []>} : vector<8x32xbf16>, vector<32x256xbf16>, vector<8x256xf32> -> vector<8x256xf32>
    %c0_3 = arith.constant 0 : index
    %c0_4 = arith.constant 0 : index
    %4 = vector.load %arg3[%c0_3, %c0_4] : memref<1x256xf32, #tpu.memory_space<vmem>>, vector<1x256xf32>
    %5 = vector.broadcast %4 : vector<1x256xf32> to vector<8x256xf32>
    %6 = arith.addf %3, %5 : vector<8x256xf32>
    %cst_5 = arith.constant 0.000000e+00 : f32
    %7 = vector.broadcast %cst_5 : f32 to vector<8x256xf32>
    %8 = arith.cmpf ogt, %6, %7 : vector<8x256xf32>
    %cst_6 = arith.constant 3.000000e-01 : f32
    %9 = vector.broadcast %cst_6 : f32 to vector<8x256xf32>
    %10 = arith.mulf %9, %6 : vector<8x256xf32>
    %11 = arith.select %8, %6, %10 : vector<8x256xi1>, vector<8x256xf32>
    %12 = arith.truncf %11 : vector<8x256xf32> to vector<8x256xbf16>
    %c0_7 = arith.constant 0 : index
    %c0_8 = arith.constant 0 : index
    %13 = vector.load %arg4[%c0_7, %c0_8] : memref<256x256xbf16, #tpu.memory_space<vmem>>, vector<256x256xbf16>
    %cst_9 = arith.constant dense<0.000000e+00> : vector<8x256xf32>
    %14 = tpu.matmul %12, %13, %cst_9 {dimension_numbers = #tpu.dot_dimension_numbers<[1], [0], [0], [1], [0, 0, 1, 1], [], []>} : vector<8x256xbf16>, vector<256x256xbf16>, vector<8x256xf32> -> vector<8x256xf32>
    %c0_10 = arith.constant 0 : index
    %c0_11 = arith.constant 0 : index
    %15 = vector.load %arg5[%c0_10, %c0_11] : memref<1x256xf32, #tpu.memory_space<vmem>>, vector<1x256xf32>
    %16 = vector.broadcast %15 : vector<1x256xf32> to vector<8x256xf32>
    %17 = arith.addf %14, %16 : vector<8x256xf32>
    %cst_12 = arith.constant 0.000000e+00 : f32
    %18 = vector.broadcast %cst_12 : f32 to vector<8x256xf32>
    %19 = arith.cmpf ogt, %17, %18 : vector<8x256xf32>
    %cst_13 = arith.constant 3.000000e-01 : f32
    %20 = vector.broadcast %cst_13 : f32 to vector<8x256xf32>
    %21 = arith.mulf %20, %17 : vector<8x256xf32>
    %22 = arith.select %19, %17, %21 : vector<8x256xi1>, vector<8x256xf32>
    %c0_14 = arith.constant 0 : index
    %c0_15 = arith.constant 0 : index
    %23 = vector.load %arg6[%c0_14, %c0_15] : memref<1x256xf32, #tpu.memory_space<vmem>>, vector<1x256xf32>
    %24 = vector.broadcast %23 : vector<1x256xf32> to vector<8x256xf32>
    %25 = arith.mulf %22, %24 : vector<8x256xf32>
    %cst_16 = arith.constant dense<0.000000e+00> : vector<8xf32>
    %26 = vector.multi_reduction <add>, %25, %cst_16 [1] : vector<8x256xf32> to vector<8xf32>
    %27 = vector.shape_cast %26 : vector<8xf32> to vector<8x1xf32>
    %c0_17 = arith.constant 0 : index
    %c0_18 = arith.constant 0 : index
    %28 = memref.load %arg7[%c0_17, %c0_18] : memref<1x1xf32, #tpu.memory_space<smem>>
    %29 = vector.broadcast %28 : f32 to vector<8x1xf32>
    %30 = arith.addf %27, %29 : vector<8x1xf32>
    %c0_19 = arith.constant 0 : index
    %c0_20 = arith.constant 0 : index
    %31 = vector.load %arg8[%c0_19, %c0_20] : memref<8x1xf32, #tpu.memory_space<vmem>>, vector<8x1xf32>
    tpu.vector_store %arg8[%c0_19, %c0_20], %30 {strides = array<i32>} : memref<8x1xf32, #tpu.memory_space<vmem>>, vector<8x1xf32>,
    return
  }
  func.func @transform_0(%arg0: i32) -> (i32, i32) {
    %c0_i32 = arith.constant 0 : i32
    %c0_i32_0 = arith.constant 0 : i32
    return %arg0, %c0_i32 : i32, i32
  }
  func.func @transform_1(%arg0: i32) -> (i32, i32) {
    %c0_i32 = arith.constant 0 : i32
    %c0_i32_0 = arith.constant 0 : i32
    %c0_i32_1 = arith.constant 0 : i32
    return %c0_i32, %c0_i32_0 : i32, i32
  }
  func.func @transform_2(%arg0: i32) -> (i32, i32) {
    %c0_i32 = arith.constant 0 : i32
    %c0_i32_0 = arith.constant 0 : i32
    %c0_i32_1 = arith.constant 0 : i32
    return %c0_i32, %c0_i32_0 : i32, i32
  }
  func.func @transform_3(%arg0: i32) -> (i32, i32) {
    %c0_i32 = arith.constant 0 : i32
    %c0_i32_0 = arith.constant 0 : i32
    %c0_i32_1 = arith.constant 0 : i32
    return %c0_i32, %c0_i32_0 : i32, i32
  }
  func.func @transform_4(%arg0: i32) -> (i32, i32) {
    %c0_i32 = arith.constant 0 : i32
    %c0_i32_0 = arith.constant 0 : i32
    %c0_i32_1 = arith.constant 0 : i32
    return %c0_i32, %c0_i32_0 : i32, i32
  }
  func.func @transform_5(%arg0: i32) -> (i32, i32) {
    %c0_i32 = arith.constant 0 : i32
    %c0_i32_0 = arith.constant 0 : i32
    %c0_i32_1 = arith.constant 0 : i32
    return %c0_i32, %c0_i32_0 : i32, i32
  }
  func.func @transform_6(%arg0: i32) -> (i32, i32) {
    %c0_i32 = arith.constant 0 : i32
    %c0_i32_0 = arith.constant 0 : i32
    %c0_i32_1 = arith.constant 0 : i32
    return %c0_i32, %c0_i32_0 : i32, i32
  }
  func.func @transform_7(%arg0: i32) -> (i32, i32) {
    %c0_i32 = arith.constant 0 : i32
    %c0_i32_0 = arith.constant 0 : i32
    return %arg0, %c0_i32 : i32, i32
  }
}

</mosaic_0001>

<bundles_post_ra>
// kernel: tpu_custom_call.1
= control target key start
LH: loop header
LB: loop body
LE: loop exit
PB: predicated region body
PF: predicated region fallthrough
CT: control target
= control target key end

     0   :  { %13 = vsyncpa [#allocation4], 0  ;;  %s668_s0 = inlined_call_operand.hbm [shape: f32[8,32], index: 0, kind: input, shape index: {}]   ;;  %s669_s1 = inlined_call_operand.hbm [shape: bf16[32,256], index: 1, kind: input, shape index: {}]   ;;  %s670_s2 = inlined_call_operand.vmem [shape: f32[1,256], index: 2, kind: input, shape index: {}]   ;;  %s671_s3 = inlined_call_operand.hbm [shape: bf16[256,256], index: 3, kind: input, shape index: {}]   ;;  %s672_s4 = inlined_call_operand.vmem [shape: f32[1,256], index: 4, kind: input, shape index: {}]   ;;  %s673_s5 = inlined_call_operand.vmem [shape: f32[1,256], index: 5, kind: input, shape index: {}]   ;;  %s674_s6 = inlined_call_operand.<no memory space> [shape: f32[1,1], index: 6, kind: input, shape index: {}]   ;;  %s675_s7 = inlined_call_operand.vmem [shape: f32[8,1], index: 7, kind: output, shape index: {}]  }
   0x1   :  { %14 = vsyncpa [#allocation6], 0  ;;  %s598_s24 = smov [#allocation5]  }
   0x2   :  { %s30_s25 = sshll.u32 %s598_s24, 4  ;;  %s31_s25 = int_to_ptr.vmem [resolvable:$true] %s30_s25 }
   0x3   :  { %s542_s26 = scalar_lea.vmem %s31_s25, 512  ;;  %p547_p1 = scmp.lt.s32.totalorder %s31_s25, %s31_s25 }
   0x4   :  { %p543_p0 = scmp.ne.s32.totalorder %s31_s25, %s542_s26  ;;  %p548_p2 = scmp.lt.s32.totalorder %s542_s26, %s542_s26 }
   0x6   :  { %p549_p3 = por %p548_p2, %p547_p1 }
   0x8   :  { %p550_p4 = pnand %p549_p3, %p543_p0 }
   0xa   :  { %553 = shalt.err (!%p550_p4)
}
   0xb   :  { %s599_s27 = smov 128   ;;  %s600_s28 = smov 8  }
   0xc   :  { %36 = dma.hbm_to_vmem [thread:$0]  %s669_s1, 512, %s31_s25, [#allocation6], %s599_s27, %s599_s27, %s600_s28  }
   0xd   :  { %s601_s8 = smov [#allocation3]   ;;  %s602_s10 = smov [#allocation7]  }
   0xe   :  { %s21_s9 = sshll.u32 %s601_s8, 4  ;;  %s44_s11 = sshll.u32 %s602_s10, 4  ;;  %s22_s9 = int_to_ptr.vmem [resolvable:$true] %s21_s9  ;;  %s45_s11 = int_to_ptr.vmem [resolvable:$true] %s44_s11 }
   0xf   :  { %s562_s12 = scalar_lea.vmem %s22_s9, 128  ;;  %p567_p6 = scmp.lt.s32.totalorder %s22_s9, %s22_s9 }
  0x10   :  { %p563_p5 = scmp.ne.s32.totalorder %s22_s9, %s562_s12  ;;  %p568_p7 = scmp.lt.s32.totalorder %s562_s12, %s562_s12 }
  0x12   :  { %p569_p8 = por %p568_p7, %p567_p6 }
  0x14   :  { %p570_p9 = pnand %p569_p8, %p563_p5 }
  0x16   :  { %573 = shalt.err (!%p570_p9)
}
  0x17   :  { %24 = dma.hbm_to_vmem [thread:$0]  %s668_s0, 128, %s22_s9, [#allocation4]  }
  0x18   :  { %s582_s15 = scalar_lea.vmem %s45_s11, 4096  ;;  %p587_p11 = scmp.lt.s32.totalorder %s45_s11, %s45_s11 }
  0x19   :  { %p583_p10 = scmp.ne.s32.totalorder %s45_s11, %s582_s15  ;;  %p588_p12 = scmp.lt.s32.totalorder %s582_s15, %s582_s15 }
  0x1b   :  { %p589_p13 = por %p588_p12, %p587_p11 }
  0x1d   :  { %p590_p0 = pnand %p589_p13, %p583_p10 }
  0x1f   :  { %593 = shalt.err (!%p590_p0)
}
  0x20   :  { %50 = dma.hbm_to_vmem [thread:$0]  %s671_s3, 4096, %s45_s11, [#allocation6], %s599_s27, %s599_s27, %s600_s28  }
  0x21   :  { %594 = dma.done.wait [#allocation4], 128  }
  0x22   :  { %595 = vsyncadd [#allocation4], 4294967168 }
  0x23   :  { %596 = dma.done.wait [#allocation6], 4608  }
  0x24   :  { %597 = vsyncadd [#allocation6], 4294962688  ;;  %v603_v0 = vmov 0   ;;  %v480_v1 = vld [vmem:[#allocation5 + $0x14] ss:$8 sps:$4 sm:$0xff]   ;;  %vm105_vm0 = vcmask 261120   ;;  %v75_v39 = vlaneseq }
  0x25   :  { %141 = vmatprep.mubr.bf16.mxu0 %v603_v0  ;;  %v482_v2 = vld [vmem:[#allocation5 + $0x10] ss:$8 sps:$4 sm:$0xff]   ;;  %121 = vmatprep.subr.bf16.mxu0 %v480_v1  ;;  %v483_v3 = vld [vmem:[#allocation5 + $0x4] ss:$8 sps:$4 sm:$0xff]   ;;  %v485_v4 = vld [vmem:[#allocation5] ss:$8 sps:$4 sm:$0xff]  }
  0x26   :  { %v67_v5 = vld [vmem:[#allocation3] sm:$0xff]  ;;  %122 = vmatpush1.bf16.msra.mxu0 %v482_v2  ;;  %v489_v8 = vld [vmem:[#allocation7 + $0x64] ss:$8 sps:$4 sm:$0xff]   ;;  %v491_v10 = vld [vmem:[#allocation7 + $0x60] ss:$8 sps:$4 sm:$0xff]   ;;  %v76_v40 = vshrl.u32 %v75_v39, 7 }
  0x27   :  { %v486_v6 = vld [vmem:[#allocation7 + $0x74] ss:$8 sps:$4 sm:$0xff]   ;;  %123 = vmatprep.subr.bf16.mxu0 %v483_v3  ;;  %v488_v7 = vld [vmem:[#allocation7 + $0x70] ss:$8 sps:$4 sm:$0xff]   ;;  %v68_v9 = vpack.c.bf16 %v67_v5, %v67_v5  ;;  %v495_v13 = vld [vmem:[#allocation7 + $0x44] ss:$8 sps:$4 sm:$0xff]  }
  0x28   :  { %362 = vmatprep.subr.bf16.mxu1 %v486_v6  ;;  %v492_v11 = vld [vmem:[#allocation7 + $0x54] ss:$8 sps:$4 sm:$0xff]   ;;  %v494_v12 = vld [vmem:[#allocation7 + $0x50] ss:$8 sps:$4 sm:$0xff]   ;;  %v497_v14 = vld [vmem:[#allocation7 + $0x40] ss:$8 sps:$4 sm:$0xff]  }
  0x29   :  { %363 = vmatpush1.bf16.msra.mxu1 %v488_v7  ;;  %v498_v15 = vld [vmem:[#allocation7 + $0x34] ss:$8 sps:$4 sm:$0xff]   ;;  %v500_v16 = vld [vmem:[#allocation7 + $0x30] ss:$8 sps:$4 sm:$0xff]   ;;  %v501_v17 = vld [vmem:[#allocation7 + $0x24] ss:$8 sps:$4 sm:$0xff]  }
  0x2a   :  { %124 = vmatpush1.bf16.msra.mxu0 %v485_v4  ;;  %364 = vmatprep.subr.bf16.mxu1 %v489_v8  ;;  %v503_v18 = vld [vmem:[#allocation7 + $0x20] ss:$8 sps:$4 sm:$0xff]   ;;  %v504_v19 = vld [vmem:[#allocation7 + $0x14] ss:$8 sps:$4 sm:$0xff]   ;;  %v506_v20 = vld [vmem:[#allocation7 + $0x10] ss:$8 sps:$4 sm:$0xff]  }
  0x2b   :  { %v507_v21 = vld [vmem:[#allocation7 + $0x4] ss:$8 sps:$4 sm:$0xff]   ;;  %v509_v22 = vld [vmem:[#allocation7] ss:$8 sps:$4 sm:$0xff]   ;;  %v510_v23 = vld [vmem:[#allocation7 + $0xf4] ss:$8 sps:$4 sm:$0xff]  }
  0x2c   :  { %v512_v24 = vld [vmem:[#allocation7 + $0xf0] ss:$8 sps:$4 sm:$0xff]   ;;  %v513_v25 = vld [vmem:[#allocation7 + $0xe4] ss:$8 sps:$4 sm:$0xff]   ;;  %v515_v26 = vld [vmem:[#allocation7 + $0xe0] ss:$8 sps:$4 sm:$0xff]  }
  0x2d   :  { %441 = vmatmul.mubr.msk.bf16.vlgmr.msra.gmra.mxu0 %vm105_vm0, %v68_v9  ;;  %365 = vmatpush1.bf16.msra.mxu1 %v491_v10  ;;  %v516_v27 = vld [vmem:[#allocation7 + $0xd4] ss:$8 sps:$4 sm:$0xff]   ;;  %v518_v28 = vld [vmem:[#allocation7 + $0xd0] ss:$8 sps:$4 sm:$0xff]   ;;  %v519_v29 = vld [vmem:[#allocation7 + $0xc4] ss:$8 sps:$4 sm:$0xff]  }
  0x2e   :  { %366 = vmatprep.subr.bf16.mxu1 %v492_v11  ;;  %v521_v30 = vld [vmem:[#allocation7 + $0xc0] ss:$8 sps:$4 sm:$0xff]   ;;  %v522_v31 = vld [vmem:[#allocation7 + $0xb4] ss:$8 sps:$4 sm:$0xff]   ;;  %v524_v32 = vld [vmem:[#allocation7 + $0xb0] ss:$8 sps:$4 sm:$0xff]  }
  0x2f   :  { %v525_v33 = vld [vmem:[#allocation7 + $0xa4] ss:$8 sps:$4 sm:$0xff]   ;;  %v527_v34 = vld [vmem:[#allocation7 + $0xa0] ss:$8 sps:$4 sm:$0xff]   ;;  %v528_v35 = vld [vmem:[#allocation7 + $0x94] ss:$8 sps:$4 sm:$0xff]  }
  0x30   :  { %v530_v36 = vld [vmem:[#allocation7 + $0x90] ss:$8 sps:$4 sm:$0xff]   ;;  %v531_v37 = vld [vmem:[#allocation7 + $0x84] ss:$8 sps:$4 sm:$0xff]   ;;  %v533_v38 = vld [vmem:[#allocation7 + $0x80] ss:$8 sps:$4 sm:$0xff]  }
  0x31   :  { %367 = vmatpush1.bf16.msra.mxu1 %v494_v12  ;;  %v77_v41 = vsub.s32 0, %v76_v40  ;;  %v73_v42 = vld [vmem:[%s670_s2] sm:$0x3]  ;;  %v81_v43 = vsub.s32 1, %v76_v40  ;;  %vm429_vm5 = vcmask 7168  }
  0x32   :  { %368 = vmatprep.subr.bf16.mxu1 %v495_v13  ;;  %v190_v58 = vld [vmem:[%s672_s4] sm:$0x3]  ;;  %v427_v13 = vstv %s674_s6 }
  0x33   :  { %v78_v44 = vrot.slane %v73_v42, %v77_v41  ;;  %v82_v45 = vrot.slane %v73_v42, %v81_v43  ;;  %v195_v59 = vrot.slane %v190_v58, %v77_v41  ;;  %v199_v60 = vrot.slane %v190_v58, %v81_v43  ;;  %v409_v63 = vld [vmem:[%s673_s5] sm:$0x3] }
  0x34   :  { %v414_v4 = vrot.slane %v409_v63, %v77_v41  ;;  %v418_v5 = vrot.slane %v409_v63, %v81_v43 }
  0x35   :  { %369 = vmatpush1.bf16.msra.mxu1 %v497_v14 }
  0x36   :  { %370 = vmatprep.subr.bf16.mxu1 %v498_v15 }
  0x39   :  { %371 = vmatpush1.bf16.msra.mxu1 %v500_v16 }
  0x3a   :  { %372 = vmatprep.subr.bf16.mxu1 %v501_v17 }
  0x3d   :  { %373 = vmatpush1.bf16.msra.mxu1 %v503_v18 }
  0x3e   :  { %374 = vmatprep.subr.bf16.mxu1 %v504_v19 }
  0x41   :  { %375 = vmatpush1.bf16.msra.mxu1 %v506_v20 }
  0x42   :  { %376 = vmatprep.subr.bf16.mxu1 %v507_v21 }
  0x45   :  { %377 = vmatpush1.bf16.msra.mxu1 %v509_v22 }
  0x46   :  { %378 = vmatprep.subr.bf16.mxu1 %v510_v23 }
  0x49   :  { %379 = vmatpush2.bf16.msra.mxu1 %v512_v24 }
  0x4a   :  { %380 = vmatprep.subr.bf16.mxu1 %v513_v25 }
  0x4d   :  { %381 = vmatpush2.bf16.msra.mxu1 %v515_v26 }
  0x4e   :  { %382 = vmatprep.subr.bf16.mxu1 %v516_v27 }
  0x51   :  { %383 = vmatpush2.bf16.msra.mxu1 %v518_v28 }
  0x52   :  { %384 = vmatprep.subr.bf16.mxu1 %v519_v29 }
  0x55   :  { %385 = vmatpush2.bf16.msra.mxu1 %v521_v30 }
  0x56   :  { %386 = vmatprep.subr.bf16.mxu1 %v522_v31 }
  0x59   :  { %387 = vmatpush2.bf16.msra.mxu1 %v524_v32 }
  0x5a   :  { %388 = vmatprep.subr.bf16.mxu1 %v525_v33 }
  0x5d   :  { %389 = vmatpush2.bf16.msra.mxu1 %v527_v34 }
  0x5e   :  { %390 = vmatprep.subr.bf16.mxu1 %v528_v35 }
  0x61   :  { %391 = vmatpush2.bf16.msra.mxu1 %v530_v36 }
  0x62   :  { %392 = vmatprep.subr.bf16.mxu1 %v531_v37 }
  0x65   :  { %393 = vmatpush2.bf16.msra.mxu1 %v533_v38 }
  0xed   :  { %v143_v46 = vpop.f32.mrf.mxu0 }
  0xee   :  { %v144_v47 = vadd.f32 %v143_v46, %v78_v44 }
  0xef   :  { %v145_v48 = vpop.f32.mrf.mxu0 }
  0xf0   :  { %vm150_vm1 = vcmp.gt.f32.partialorder %v144_v47, 0.0  ;;  %v152_v49 = vmul.f32 0.3, %v144_v47  ;;  %v146_v50 = vadd.f32 %v145_v48, %v82_v45 }
  0xf1   :  { %v147_v51 = vpop.f32.mrf.mxu0 }
  0xf2   :  { %vm151_vm2 = vcmp.gt.f32.partialorder %v146_v50, 0.0  ;;  %v153_v52 = vmul.f32 0.3, %v146_v50  ;;  %v154_v54 = vsel %vm150_vm1, %v144_v47, %v152_v49 }
  0xf3   :  { %v148_v53 = vpop.f32.mrf.mxu0  ;;  %v156_v57 = vpack.c.bf16 %v154_v54, %v154_v54 }
  0xf4   :  { %v155_v55 = vsel %vm151_vm2, %v146_v50, %v153_v52 }
  0xf5   :  { %v157_v56 = vpack.c.bf16 %v155_v55, %v155_v55 }
  0xf7   :  { %394 = vmatprep.mubr.bf16.mxu1 %v157_v56 }
  0xf8   :  { %395 = vmatmul.mubr.bf16.vlgmr.msra.gmra.mxu1 %v156_v57 }
 0x1b8   :  { %v396_v61 = vpop.f32.mrf.mxu1 }
 0x1b9   :  { %v397_v62 = vadd.f32 %v396_v61, %v195_v59 }
 0x1ba   :  { %v398_v0 = vpop.f32.mrf.mxu1 }
 0x1bb   :  { %vm403_vm3 = vcmp.gt.f32.partialorder %v397_v62, 0.0  ;;  %v405_v1 = vmul.f32 0.3, %v397_v62  ;;  %v399_v2 = vadd.f32 %v398_v0, %v199_v60 }
 0x1bc   :  { %v400_v3 = vpop.f32.mrf.mxu1 }
 0x1bd   :  { %vm404_vm4 = vcmp.gt.f32.partialorder %v399_v2, 0.0  ;;  %v406_v6 = vmul.f32 0.3, %v399_v2  ;;  %v407_v7 = vsel %vm403_vm3, %v397_v62, %v405_v1 }
 0x1be   :  { %v401_v8 = vpop.f32.mrf.mxu1  ;;  %v421_v10 = vmul.f32 %v414_v4, %v407_v7 }
 0x1bf   :  { %v408_v9 = vsel %vm404_vm4, %v399_v2, %v406_v6 }
 0x1c0   :  { %v422_v11 = vmul.f32 %v418_v5, %v408_v9 }
 0x1c2   :  { %v423_v12 = vadd.f32 %v422_v11, %v421_v10 }
 0x1c4   :  { %424 = vadd.xlane.f32.xlu0 %v423_v12 }
 0x24d   :  { %v425_v14 = vpop.xlane.xlu0 %424 }
 0x24e   :  { %v428_v15 = vadd.f32 %v427_v13, %v425_v14 }
 0x250   :  { %430 = vst.msk [vmem:[%s675_s7] sm:$0xff] %vm429_vm5, %v428_v15 }
 0x251   :  { %435 = vsyncpa [#allocation4], 1 }
 0x252   :  { %436 = vsyncpa [#allocation6], 1 }

</bundles_post_ra>
